<compile_context>
chip_gen: v6e
topology: v6e:2x2x1
jax: 0.10.0
libtpu: 0.0.40
codegen_flags: <defaults>
</compile_context>

<pallas_src>
import math

import jax
import jax.numpy as jnp
from jax.experimental import pallas as pl
from jax.experimental.pallas import tpu as pltpu


_TARGET_CHUNK_BYTES = 8 * 1024 * 1024   # ~8 MiB of payload per DMA chunk
_MAX_CHUNKS = 16                        # cap on grid length


def _choose_num_chunks(b: int, row_bytes: int) -> int:
    """Largest divisor of b giving >= ~_TARGET_CHUNK_BYTES per chunk (capped)."""
    total = b * row_bytes
    max_chunks = int(min(_MAX_CHUNKS, b, max(1, total // _TARGET_CHUNK_BYTES)))
    best = 1
    for c in range(1, max_chunks + 1):
        if b % c == 0:
            best = c
    return best


def _make_dma_copy_kernel(rows_per_chunk: int):
    """Kernel: copy one row-chunk of the (rows, n) slab HBM -> HBM via DMA."""

    def kernel(x_hbm, o_hbm, sem):
        i = pl.program_id(0)
        start = pl.multiple_of(i * rows_per_chunk, rows_per_chunk)
        cp = pltpu.make_async_copy(
            x_hbm.at[pl.ds(start, rows_per_chunk)],
            o_hbm.at[pl.ds(start, rows_per_chunk)],
            sem,
        )
        cp.start()
        cp.wait()

    return kernel


def flatten(x: jax.Array) -> jax.Array:
    """Equivalent of PyTorch Flatten: (B, ...) -> (B, prod(rest))."""
    b = x.shape[0]
    n = math.prod(x.shape[1:])

    x2d = x.reshape(b, n)  # metadata-only row-major view (== torch .view semantics)
    if b == 0 or n == 0:
        return x2d         # nothing to copy

    itemsize = jnp.dtype(x.dtype).itemsize
    num_chunks = _choose_num_chunks(b, n * itemsize)
    rows_per_chunk = b // num_chunks

    return pl.pallas_call(
        _make_dma_copy_kernel(rows_per_chunk),
        out_shape=jax.ShapeDtypeStruct((b, n), x.dtype),
        grid_spec=pltpu.PrefetchScalarGridSpec(
            num_scalar_prefetch=0,
            grid=(num_chunks,),
            in_specs=[pl.BlockSpec(memory_space=pl.ANY)],
            out_specs=pl.BlockSpec(memory_space=pl.ANY),
            scratch_shapes=[pltpu.SemaphoreType.DMA(())],
        ),
        compiler_params=pltpu.CompilerParams(
            dimension_semantics=("parallel",),
        ),
    )(x2d)


if __name__ == "__main__":
    key = jax.random.PRNGKey(0)

    # NCHW input, consistent with typical conv-net usage of Flatten.
    x = jax.random.normal(key, (2, 4, 16, 16), dtype=jnp.float32)
    y = flatten(x)
    jax.block_until_ready(y)

    ref = x.reshape(x.shape[0], -1)
    assert y.shape == (2, 4 * 16 * 16), y.shape
    assert y.dtype == x.dtype
    assert bool(jnp.array_equal(y, ref))

    # Extra sanity check: odd / non-128-multiple inner size + narrow dtype.
    # The HBM->HBM DMA path has no (8,128) or sublane-packing constraints,
    # so no ragged fallback is needed.
    x2 = jax.random.normal(key, (3, 5, 7), dtype=jnp.bfloat16)
    y2 = flatten(x2)
    jax.block_until_ready(y2)
    assert y2.shape == (3, 35)
    assert bool(jnp.array_equal(y2, x2.reshape(3, -1)))

    print("KERNEL_OK")
</pallas_src>

<mosaic_0001>
module attributes {stable_mosaic.version = 11 : i64} {
  func.func @kernel(%arg0: i32, %arg1: memref<2x1024xf32, #tpu.memory_space<any>>, %arg2: memref<2x1024xf32, #tpu.memory_space<any>>, %arg3: memref<!tpu.dma_semaphore, #tpu.memory_space<semaphore_mem>>) attributes {dimension_semantics = [#tpu.dimension_semantics<parallel>], iteration_bounds = array<i64: 1>, scalar_prefetch = 0 : i64, scratch_operands = 1 : i64, tpu.core_type = #tpu.core_type<tc>, window_params = [{}, {}]} {
    %c2_i32 = arith.constant 2 : i32
    %0 = arith.muli %arg0, %c2_i32 : i32
    %1 = tpu.assume_multiple %0, 2 : i32
    %c0_i32 = arith.constant 0 : i32
    %2 = tpu.memref_slice %arg1[%1, %c0_i32] : memref<2x1024xf32, #tpu.memory_space<any>> -> memref<2x1024xf32, #tpu.memory_space<any>>
    %c0_i32_0 = arith.constant 0 : i32
    %3 = tpu.memref_slice %arg2[%1, %c0_i32_0] : memref<2x1024xf32, #tpu.memory_space<any>> -> memref<2x1024xf32, #tpu.memory_space<any>>
    tpu.enqueue_dma source(%2 : memref<2x1024xf32, #tpu.memory_space<any>>) target(%3 : memref<2x1024xf32, #tpu.memory_space<any>>) target_semaphore(%arg3 : memref<!tpu.dma_semaphore, #tpu.memory_space<semaphore_mem>>)
    %c0_i32_1 = arith.constant 0 : i32
    %4 = tpu.memref_slice %arg1[%1, %c0_i32_1] : memref<2x1024xf32, #tpu.memory_space<any>> -> memref<2x1024xf32, #tpu.memory_space<any>>
    %c0_i32_2 = arith.constant 0 : i32
    %5 = tpu.memref_slice %arg2[%1, %c0_i32_2] : memref<2x1024xf32, #tpu.memory_space<any>> -> memref<2x1024xf32, #tpu.memory_space<any>>
    tpu.wait_dma2 semaphore(%arg3 : memref<!tpu.dma_semaphore, #tpu.memory_space<semaphore_mem>>) src(%4 : memref<2x1024xf32, #tpu.memory_space<any>>) dst(%5 : memref<2x1024xf32, #tpu.memory_space<any>>)
    return
  }
}

</mosaic_0001>

<bundles_post_ra>
// kernel: tpu_custom_call.1
= control target key start
LH: loop header
LB: loop body
LE: loop exit
PB: predicated region body
PF: predicated region fallthrough
CT: control target
= control target key end

     0   :  { %s41_s6 = smov [#allocation2]   ;;  %s42_s7 = smov 131072   ;;  %s60_s0 = inlined_call_operand.hbm [shape: f32[2,1024], index: 0, kind: input, shape index: {}]   ;;  %s61_s1 = inlined_call_operand.hbm [shape: f32[2,1024], index: 1, kind: output, shape index: {}]  }
   0x1   :  { %s43_s8 = smov 0  }
   0x2   :  { %20 = dma.general %s60_s0, 256, %s61_s1, %s41_s6, %s42_s7, [#allocation4], %s43_s8, 0  }
   0x3   :  { %39 = dma.done.wait [#allocation2], 256 }
   0x4   :  { %40 = vsyncadd [#allocation2], 4294967040 }
   0x5   :  { %25 = vsyncmov [#allocation2] }
   0x8   :  { %s26_s13 = vpop.sfrf %25 }
   0x9   :  { %p35_p0 = scmp.ne.s32.totalorder %s26_s13, 0 }
   0xb   :  { %30 = shalt.err (%p35_p0)  }

</bundles_post_ra>
